<compile_context>
chip_gen: v6e
topology: v6e:2x2x1
jax: 0.10.0
libtpu: 0.0.40
codegen_flags: <defaults>
</compile_context>

<pallas_src>
import jax
import jax.numpy as jnp
from jax.experimental import pallas as pl
from jax.experimental.pallas import tpu as pltpu


_LANE = 128
_SMALL_N_THRESHOLD = 1 << 15     # below this the custom-call overhead dominates
_TARGET_BLOCK_BYTES = 4 << 20    # ~4 MiB per buffer: near HBM roofline on all gens
_VMEM_LIMIT_BYTES = 32 << 20     # conservative scoped-VMEM cap (v7x has 64 MiB total)


def _make_mask_kernel(scale: float):
    def kernel(x_ref, o_ref):
        # Single VPU broadcast-multiply; `scale` is a trace-time constant.
        o_ref[...] = x_ref[...] * scale
    return kernel


def _pick_lane_width(n_pad: int) -> int:
    # Widest lane-dense last dim that tiles the (128-aligned) element count exactly.
    for c in (8192, 4096, 2048, 1024, 512, 256, 128):
        if n_pad % c == 0:
            return c
    return _LANE


def _pick_block_rows(rows: int, lane: int, itemsize: int) -> int:
    if rows <= 8:
        return rows  # block dim == full array dim is always legal
    target_rows = max(8, (_TARGET_BLOCK_BYTES // (lane * itemsize)) // 8 * 8)
    block_rows = min(target_rows, (rows // 8) * 8)  # multiple of 8, <= rows
    # v7x has 2 TensorCores: avoid collapsing to a single grid program when there
    # is enough work to split (the extra ~0.35us step is negligible on v5e/v6e).
    if pl.cdiv(rows, block_rows) == 1 and rows >= 16:
        block_rows = max(8, (((rows + 1) // 2) + 7) // 8 * 8)
    return block_rows


def masking_feasibility(x: jax.Array, unseen_score: float, *,
                        force_pallas: bool = False,
                        donate_input: bool = False) -> jax.Array:
    """Equivalent of MaskingFeasibityMod(attr, obj, cls, unseen_score).forward(x)."""
    orig_shape = x.shape
    orig_dtype = x.dtype
    n = x.size
    scale = float(unseen_score)

    if n == 0:
        return x

    # Tiny inputs: a fused XLA elementwise multiply beats a custom call.
    if n < _SMALL_N_THRESHOLD and not force_pallas:
        return x * scale

    # Lane-dense 2D slab.  Pad only to a multiple of 128 (<= 127 extra elements),
    # and only when the size is not already aligned (typical NCHW sizes are).
    flat = x.reshape(-1)
    pad = (-n) % _LANE
    if pad:
        flat = jnp.pad(flat, (0, pad))
    n_pad = n + pad

    lane = _pick_lane_width(n_pad)
    rows = n_pad // lane
    x2d = flat.reshape(rows, lane)

    itemsize = jnp.dtype(orig_dtype).itemsize
    block_rows = _pick_block_rows(rows, lane, itemsize)
    # cdiv grid: a partial trailing block is masked by Pallas, never dropped.
    grid = (pl.cdiv(rows, block_rows),)

    out2d = pl.pallas_call(
        _make_mask_kernel(scale),
        out_shape=jax.ShapeDtypeStruct((rows, lane), orig_dtype),
        grid_spec=pltpu.PrefetchScalarGridSpec(
            num_scalar_prefetch=0,
            grid=grid,
            in_specs=[pl.BlockSpec((block_rows, lane), lambda i: (i, 0))],
            out_specs=pl.BlockSpec((block_rows, lane), lambda i: (i, 0)),
        ),
        compiler_params=pltpu.CompilerParams(
            dimension_semantics=("parallel",),
            vmem_limit_bytes=_VMEM_LIMIT_BYTES,
        ),
        input_output_aliases=({0: 0} if donate_input else {}),
    )(x2d)

    if pad:
        return out2d.reshape(-1)[:n].reshape(orig_shape)
    return out2d.reshape(orig_shape)


if __name__ == "__main__":
    # Deterministic module "parameters" (no checkpoint load): __init__ args.
    attr_size, obj_size, class_size = 32, 32, 64   # unused by forward
    unseen_score = -50.0                            # self.mask = unseen_score

    key = jax.random.PRNGKey(0)
    k1, k2, k3 = jax.random.split(key, 3)

    # 1) Module's natural small NCHW shape; force the Pallas path so the kernel runs
    #    (the dispatcher would otherwise route this tiny size through plain XLA).
    x = jax.random.normal(k1, (2, 4, 16, 16), dtype=jnp.float32)
    y = masking_feasibility(x, unseen_score, force_pallas=True)
    jax.block_until_ready(y)
    assert y.shape == x.shape and y.dtype == x.dtype
    assert jnp.allclose(y, x * unseen_score, rtol=1e-6, atol=1e-6)

    # 2) Larger 128-aligned activation: wide lane slab, multi-program grid,
    #    masked partial tail block (rows not a multiple of block_rows).
    xb = jax.random.normal(k2, (4, 64, 56, 56), dtype=jnp.float32)
    yb = masking_feasibility(xb, unseen_score)
    jax.block_until_ready(yb)
    assert jnp.allclose(yb, xb * unseen_score, rtol=1e-6, atol=1e-6)

    # 3) Non-128-divisible element count: exercises the minimal pad/slice path.
    xc = jax.random.normal(k3, (3, 5, 7, 11), dtype=jnp.float32)
    yc = masking_feasibility(xc, unseen_score, force_pallas=True)
    jax.block_until_ready(yc)
    assert yc.shape == xc.shape and jnp.allclose(yc, xc * unseen_score, rtol=1e-6, atol=1e-6)

    # 4) bf16 path + input donation (aliasing) sanity check.
    xd = jax.random.normal(k1, (8, 1024), dtype=jnp.bfloat16)
    yd = masking_feasibility(xd, unseen_score, force_pallas=True, donate_input=True)
    jax.block_until_ready(yd)
    assert yd.dtype == jnp.bfloat16
    assert jnp.allclose(yd.astype(jnp.float32),
                        (xd * unseen_score).astype(jnp.float32), rtol=1e-2, atol=1e-2)

    print("KERNEL_OK")
</pallas_src>

<mosaic_0001>
module attributes {stable_mosaic.version = 11 : i64} {
  func.func @kernel(%arg0: i32, %arg1: memref<1x2048xf32, #tpu.memory_space<vmem>>, %arg2: memref<1x2048xf32, #tpu.memory_space<vmem>>) attributes {dimension_semantics = [#tpu.dimension_semantics<parallel>], iteration_bounds = array<i64: 1>, scalar_prefetch = 0 : i64, scratch_operands = 0 : i64, tpu.core_type = #tpu.core_type<tc>, window_params = [{transform_indices = @transform_0, window_bounds = array<i64: 1, 2048>}, {transform_indices = @transform_1, window_bounds = array<i64: 1, 2048>}]} {
    %c0 = arith.constant 0 : index
    %c0_0 = arith.constant 0 : index
    %0 = vector.load %arg1[%c0, %c0_0] : memref<1x2048xf32, #tpu.memory_space<vmem>>, vector<1x2048xf32>
    %cst = arith.constant -5.000000e+01 : f32
    %1 = vector.broadcast %cst : f32 to vector<1x2048xf32>
    %2 = arith.mulf %0, %1 : vector<1x2048xf32>
    %c0_1 = arith.constant 0 : index
    %c0_2 = arith.constant 0 : index
    %3 = vector.load %arg2[%c0_1, %c0_2] : memref<1x2048xf32, #tpu.memory_space<vmem>>, vector<1x2048xf32>
    tpu.vector_store %arg2[%c0_1, %c0_2], %2 {strides = array<i32>} : memref<1x2048xf32, #tpu.memory_space<vmem>>, vector<1x2048xf32>,
    return
  }
  func.func @transform_0(%arg0: i32) -> (i32, i32) {
    %c0_i32 = arith.constant 0 : i32
    %c0_i32_0 = arith.constant 0 : i32
    return %arg0, %c0_i32 : i32, i32
  }
  func.func @transform_1(%arg0: i32) -> (i32, i32) {
    %c0_i32 = arith.constant 0 : i32
    %c0_i32_0 = arith.constant 0 : i32
    return %arg0, %c0_i32 : i32, i32
  }
}

</mosaic_0001>

<bundles_post_ra>
// kernel: tpu_custom_call.1
= control target key start
LH: loop header
LB: loop body
LE: loop exit
PB: predicated region body
PF: predicated region fallthrough
CT: control target
= control target key end

     0   :  { %6 = vsyncpa [#allocation3], 0  ;;  %s106_s0 = inlined_call_operand.hbm [shape: f32[1,2048], index: 0, kind: input, shape index: {}]   ;;  %s107_s1 = inlined_call_operand.hbm [shape: f32[1,2048], index: 1, kind: output, shape index: {}]  }
   0x1   :  { %7 = vsyncpa [#allocation4], 0  ;;  %s88_s6 = smov [#allocation2]  }
   0x2   :  { %s14_s7 = sshll.u32 %s88_s6, 4  ;;  %s15_s7 = int_to_ptr.vmem [resolvable:$true] %s14_s7 }
   0x3   :  { %s52_s8 = scalar_lea.vmem %s15_s7, 256  ;;  %p57_p1 = scmp.lt.s32.totalorder %s15_s7, %s15_s7 }
   0x4   :  { %p53_p0 = scmp.ne.s32.totalorder %s15_s7, %s52_s8  ;;  %p58_p2 = scmp.lt.s32.totalorder %s52_s8, %s52_s8 }
   0x6   :  { %p59_p3 = por %p58_p2, %p57_p1 }
   0x8   :  { %p60_p4 = pnand %p59_p3, %p53_p0 }
   0xa   :  { %63 = shalt.err (!%p60_p4)
}
   0xb   :  { %17 = dma.hbm_to_vmem [thread:$0]  %s106_s0, 256, %s15_s7, [#allocation3]  }
   0xc   :  { %84 = dma.done.wait [#allocation3], 256  }
   0xd   :  { %85 = vsyncadd [#allocation3], 4294967040  ;;  %s89_s11 = smov [#allocation5]   ;;  %v21_v0 = vld [vmem:[#allocation2] sm:$0xff]  ;;  %v22_v1 = vld [vmem:[#allocation2 + $0x8] sm:$0xff] }
   0xe   :  { %s33_s12 = sshll.u32 %s89_s11, 4  ;;  %v23_v2 = vmul.f32 -50.0, %v21_v0  ;;  %v24_v3 = vmul.f32 -50.0, %v22_v1  ;;  %s34_s12 = int_to_ptr.vmem [resolvable:$true] %s33_s12 }
   0xf   :  { %s64_s13 = scalar_lea.vmem %s34_s12, 256  ;;  %p69_p6 = scmp.lt.s32.totalorder %s34_s12, %s34_s12 }
  0x10   :  { %25 = vst [vmem:[#allocation5] sm:$0xff] %v23_v2  ;;  %26 = vst [vmem:[#allocation5 + $0x8] sm:$0xff] %v24_v3  ;;  %p65_p5 = scmp.ne.s32.totalorder %s34_s12, %s64_s13  ;;  %p70_p7 = scmp.lt.s32.totalorder %s64_s13, %s64_s13 }
  0x12   :  { %p71_p8 = por %p70_p7, %p69_p6 }
  0x14   :  { %p72_p9 = pnand %p71_p8, %p65_p5 }
  0x16   :  { %75 = shalt.err (!%p72_p9)
}
  0x17   :  { %36 = dma.vmem_to_hbm [thread:$0]  %s34_s12, 256, %s107_s1, [#allocation4]  }
  0x18   :  { %86 = dma.done.wait [#allocation4], 256  }
  0x19   :  { %87 = vsyncadd [#allocation4], 4294967040 }
  0x1a   :  { %40 = vsyncpa [#allocation3], 1 }
  0x1b   :  { %41 = vsyncpa [#allocation4], 1 }

</bundles_post_ra>
